<compile_context>
chip_gen: v7x
topology: tpu7x:2x2x1
jax: 0.10.0
libtpu: 0.0.40
codegen_flags: <defaults>
</compile_context>

<pallas_src>
import math

import jax
import jax.numpy as jnp
from jax.experimental import pallas as pl
from jax.experimental.pallas import tpu as pltpu

LOG2 = math.log(2.0)


def _shifted_softplus(x):
    # ln(0.5 * exp(x) + 0.5) == softplus(x) - ln(2)  (EUP exp/log, VPU add)
    return jnp.logaddexp(x, 0.0) - LOG2


def dipole_kernel(x_ref, pos_ref, mask_ref,
                  w1_ref, b1_ref, w2_ref, b2_ref,
                  y_ref):
    # x_ref:    (TB, A, D)   pos_ref: (TB, A, 3)   mask_ref: (TB, A)
    # w1_ref:   (D, H)       b1_ref:  (1, H)
    # w2_ref:   (1, H)       b2_ref:  (1,)  [SMEM scalar]
    # y_ref:    (TB, 3)
    TB, A, D = x_ref.shape
    H = w1_ref.shape[1]

    # --- hidden layer: one large MXU matmul over every atom in the block ----
    x2 = x_ref[...].reshape(TB * A, D)                               # [TB*A, D]
    h = jnp.dot(x2, w1_ref[...],
                preferred_element_type=jnp.float32) + b1_ref[...]    # [TB*A, H]
    h = _shifted_softplus(h)
    h = h.reshape(TB, A, H)                                          # [TB, A, H]

    # --- output layer (H -> 1): VPU multiply + XLU lane reduction ----------
    # Bias is folded in before masking (mask zeroes padded atoms' charges,
    # matching charges = out_net(x) * atom_mask).
    q = jnp.sum(h * w2_ref[...], axis=-1) + b2_ref[0]                # [TB, A]
    q = q * mask_ref[...].astype(jnp.float32)                        # [TB, A]

    # --- dipole: per-molecule atom sum of positions * latent charge --------
    yi = pos_ref[...].astype(jnp.float32) * q[:, :, None]            # [TB, A, 3]
    y_ref[...] = jnp.sum(yi, axis=1).astype(y_ref.dtype)             # [TB, 3]


def _choose_tb(B, A, D):
    """Batch block: >= ~1024 matmul rows, double-buffered streams kept small."""
    target_rows = 1024
    tb = max(1, target_rows // max(A, 1))
    # Keep 2x (x + pos + mask) blocks well under the 32 MiB scoped-VMEM default
    # (v7x has only 64 MiB physical VMEM): cap the per-step input slab ~8 MiB.
    bytes_per_mol = A * (D + 3 + 1) * 4
    max_tb = max(1, (8 * 1024 * 1024) // (2 * bytes_per_mol))
    tb = min(tb, max_tb)
    if tb >= B:
        return B
    # When blocking (tb < B), tb must be a multiple of 8 so the (TB, A) and
    # (TB, 3) block shapes satisfy the sublane constraint on partial blocks.
    tb = max(8, (tb // 8) * 8)
    return min(tb, B)


def dipole_moment(x, positions, atom_mask, w1, b1, w2, b2):
    """Pallas wrapper. x: [B,A,D], positions: [B,A,3], atom_mask: [B,A]."""
    B, A, D = x.shape
    H = w1.shape[1]
    w2_row = w2.reshape(1, H)     # tiny weight reshape (not an activation pass)
    b1_2d = b1.reshape(1, H)
    b2_1d = b2.reshape(1)

    TB = _choose_tb(B, A, D)
    grid = (pl.cdiv(B, TB),)
    # Tail blocks (B % TB != 0) are safe: every row is independent and
    # out-of-bounds output rows are clipped on store.

    y = pl.pallas_call(
        dipole_kernel,
        out_shape=jax.ShapeDtypeStruct((B, 3), jnp.float32),
        grid_spec=pltpu.PrefetchScalarGridSpec(
            num_scalar_prefetch=0,
            grid=grid,
            in_specs=[
                pl.BlockSpec((TB, A, D), lambda b: (b, 0, 0)),       # x
                pl.BlockSpec((TB, A, 3), lambda b: (b, 0, 0)),       # positions
                pl.BlockSpec((TB, A), lambda b: (b, 0)),             # atom_mask
                pl.BlockSpec((D, H), lambda b: (0, 0)),              # w1
                pl.BlockSpec((1, H), lambda b: (0, 0)),              # b1
                pl.BlockSpec((1, H), lambda b: (0, 0)),              # w2 (row)
                pl.BlockSpec(memory_space=pltpu.MemorySpace.SMEM),   # b2 scalar
            ],
            out_specs=pl.BlockSpec((TB, 3), lambda b: (b, 0)),
        ),
        compiler_params=pltpu.CompilerParams(
            dimension_semantics=("parallel",)),
    )(x, positions, atom_mask, w1, b1_2d, w2_row, b2_1d)
    return y


def reference_dipole(x, positions, atom_mask, w1, b1, w2, b2):
    h = _shifted_softplus(x @ w1 + b1)              # [B, A, H]
    q = h @ w2 + b2                                 # [B, A, 1]
    q = q * atom_mask[:, :, None]
    yi = positions * q
    return jnp.sum(yi, axis=1)                      # [B, 3]


if __name__ == "__main__":
    B, A, n_in = 2, 8, 32
    H = n_in // 2  # pyramidal MLP hidden size

    key = jax.random.PRNGKey(0)
    k_x, k_pos, k_w1, k_b1, k_w2, k_b2 = jax.random.split(key, 6)

    x = jax.random.normal(k_x, (B, A, n_in), dtype=jnp.float32)
    positions = jax.random.normal(k_pos, (B, A, 3), dtype=jnp.float32)
    # mask the last two atoms of molecule 1 (padding atoms)
    atom_mask = jnp.ones((B, A), dtype=jnp.float32)
    atom_mask = atom_mask.at[1, A - 2:].set(0.0)

    # Deterministic PyTorch-style Linear init: U(-1/sqrt(fan_in), 1/sqrt(fan_in))
    bound1 = 1.0 / math.sqrt(n_in)
    w1 = jax.random.uniform(k_w1, (n_in, H), minval=-bound1, maxval=bound1,
                            dtype=jnp.float32)
    b1 = jax.random.uniform(k_b1, (H,), minval=-bound1, maxval=bound1,
                            dtype=jnp.float32)
    bound2 = 1.0 / math.sqrt(H)
    w2 = jax.random.uniform(k_w2, (H, 1), minval=-bound2, maxval=bound2,
                            dtype=jnp.float32)
    b2 = jax.random.uniform(k_b2, (1,), minval=-bound2, maxval=bound2,
                            dtype=jnp.float32)

    y = dipole_moment(x, positions, atom_mask, w1, b1, w2, b2)
    jax.block_until_ready(y)

    y_ref = reference_dipole(x, positions, atom_mask, w1, b1, w2, b2)
    assert y.shape == (B, 3)
    assert jnp.allclose(y, y_ref, atol=1e-5, rtol=1e-5), (y, y_ref)

    print("KERNEL_OK")
</pallas_src>

<mosaic_0001>
module attributes {stable_mosaic.version = 11 : i64} {
  func.func @dipole_kernel(%arg0: i32, %arg1: memref<2x8x32xf32, #tpu.memory_space<vmem>>, %arg2: memref<2x8x3xf32, #tpu.memory_space<vmem>>, %arg3: memref<2x8xf32, #tpu.memory_space<vmem>>, %arg4: memref<32x16xf32, #tpu.memory_space<vmem>>, %arg5: memref<1x16xf32, #tpu.memory_space<vmem>>, %arg6: memref<1x16xf32, #tpu.memory_space<vmem>>, %arg7: memref<1xf32, #tpu.memory_space<smem>>, %arg8: memref<2x3xf32, #tpu.memory_space<vmem>>) attributes {dimension_semantics = [#tpu.dimension_semantics<parallel>], iteration_bounds = array<i64: 1>, scalar_prefetch = 0 : i64, scratch_operands = 0 : i64, tpu.core_type = #tpu.core_type<tc>, window_params = [{transform_indices = @transform_0, window_bounds = array<i64: 2, 8, 32>}, {transform_indices = @transform_1, window_bounds = array<i64: 2, 8, 3>}, {transform_indices = @transform_2, window_bounds = array<i64: 2, 8>}, {pipeline_mode = #tpu.pipeline_mode<synchronous>, transform_indices = @transform_3, window_bounds = array<i64: 32, 16>}, {pipeline_mode = #tpu.pipeline_mode<synchronous>, transform_indices = @transform_4, window_bounds = array<i64: 1, 16>}, {pipeline_mode = #tpu.pipeline_mode<synchronous>, transform_indices = @transform_5, window_bounds = array<i64: 1, 16>}, {transform_indices = @transform_6, window_bounds = array<i64: 1>}, {transform_indices = @transform_7, window_bounds = array<i64: 2, 3>}]} {
    %c0 = arith.constant 0 : index
    %c0_0 = arith.constant 0 : index
    %c0_1 = arith.constant 0 : index
    %0 = vector.load %arg1[%c0, %c0_0, %c0_1] : memref<2x8x32xf32, #tpu.memory_space<vmem>>, vector<2x8x32xf32>
    %1 = vector.shape_cast %0 : vector<2x8x32xf32> to vector<16x32xf32>
    %c0_2 = arith.constant 0 : index
    %c0_3 = arith.constant 0 : index
    %2 = vector.load %arg4[%c0_2, %c0_3] : memref<32x16xf32, #tpu.memory_space<vmem>>, vector<32x16xf32>
    %cst = arith.constant dense<0.000000e+00> : vector<16x16xf32>
    %3 = tpu.matmul %1, %2, %cst {dimension_numbers = #tpu.dot_dimension_numbers<[1], [0], [0], [1], [0, 0, 1, 1], [], []>} : vector<16x32xf32>, vector<32x16xf32>, vector<16x16xf32> -> vector<16x16xf32>
    %c0_4 = arith.constant 0 : index
    %c0_5 = arith.constant 0 : index
    %4 = vector.load %arg5[%c0_4, %c0_5] : memref<1x16xf32, #tpu.memory_space<vmem>>, vector<1x16xf32>
    %5 = vector.broadcast %4 : vector<1x16xf32> to vector<16x16xf32>
    %6 = arith.addf %3, %5 : vector<16x16xf32>
    %cst_6 = arith.constant 0.000000e+00 : f32
    %7 = vector.broadcast %cst_6 : f32 to vector<16x16xf32>
    %8 = arith.maximumf %6, %7 : vector<16x16xf32>
    %9 = vector.broadcast %cst_6 : f32 to vector<16x16xf32>
    %10 = arith.subf %6, %9 : vector<16x16xf32>
    %11 = arith.cmpf one, %10, %10 : vector<16x16xf32>
    %12 = vector.broadcast %cst_6 : f32 to vector<16x16xf32>
    %13 = arith.addf %6, %12 : vector<16x16xf32>
    %14 = math.absf %10 : vector<16x16xf32>
    %cst_7 = arith.constant 0.000000e+00 : f32
    %15 = vector.broadcast %cst_7 : f32 to vector<16x16xf32>
    %16 = arith.subf %15, %14 : vector<16x16xf32>
    %17 = math.exp %16 : vector<16x16xf32>
    %18 = math.log1p %17 : vector<16x16xf32>
    %19 = arith.addf %8, %18 : vector<16x16xf32>
    %20 = arith.select %11, %13, %19 : vector<16x16xi1>, vector<16x16xf32>
    %cst_8 = arith.constant 0.693147182 : f32
    %21 = vector.broadcast %cst_8 : f32 to vector<16x16xf32>
    %22 = arith.subf %20, %21 : vector<16x16xf32>
    %23 = vector.shape_cast %22 : vector<16x16xf32> to vector<2x8x16xf32>
    %c0_9 = arith.constant 0 : index
    %c0_10 = arith.constant 0 : index
    %24 = vector.load %arg6[%c0_9, %c0_10] : memref<1x16xf32, #tpu.memory_space<vmem>>, vector<1x16xf32>
    %25 = vector.shape_cast %24 : vector<1x16xf32> to vector<1x1x16xf32>
    %26 = vector.broadcast %25 : vector<1x1x16xf32> to vector<2x8x16xf32>
    %27 = arith.mulf %23, %26 : vector<2x8x16xf32>
    %cst_11 = arith.constant dense<0.000000e+00> : vector<2x8xf32>
    %28 = vector.multi_reduction <add>, %27, %cst_11 [2] : vector<2x8x16xf32> to vector<2x8xf32>
    %c0_12 = arith.constant 0 : index
    %29 = memref.load %arg7[%c0_12] : memref<1xf32, #tpu.memory_space<smem>>
    %30 = vector.broadcast %29 : f32 to vector<2x8xf32>
    %31 = arith.addf %28, %30 : vector<2x8xf32>
    %c0_13 = arith.constant 0 : index
    %c0_14 = arith.constant 0 : index
    %32 = vector.load %arg3[%c0_13, %c0_14] : memref<2x8xf32, #tpu.memory_space<vmem>>, vector<2x8xf32>
    %33 = arith.mulf %31, %32 : vector<2x8xf32>
    %c0_15 = arith.constant 0 : index
    %c0_16 = arith.constant 0 : index
    %c0_17 = arith.constant 0 : index
    %34 = vector.load %arg2[%c0_15, %c0_16, %c0_17] : memref<2x8x3xf32, #tpu.memory_space<vmem>>, vector<2x8x3xf32>
    %35 = vector.shape_cast %33 : vector<2x8xf32> to vector<2x8x1xf32>
    %36 = vector.broadcast %35 : vector<2x8x1xf32> to vector<2x8x3xf32>
    %37 = arith.mulf %34, %36 : vector<2x8x3xf32>
    %cst_18 = arith.constant dense<0.000000e+00> : vector<2x3xf32>
    %38 = vector.multi_reduction <add>, %37, %cst_18 [1] : vector<2x8x3xf32> to vector<2x3xf32>
    %c0_19 = arith.constant 0 : index
    %c0_20 = arith.constant 0 : index
    %39 = vector.load %arg8[%c0_19, %c0_20] : memref<2x3xf32, #tpu.memory_space<vmem>>, vector<2x3xf32>
    tpu.vector_store %arg8[%c0_19, %c0_20], %38 {strides = array<i32>} : memref<2x3xf32, #tpu.memory_space<vmem>>, vector<2x3xf32>,
    return
  }
  func.func @transform_0(%arg0: i32) -> (i32, i32, i32) {
    %c0_i32 = arith.constant 0 : i32
    %c0_i32_0 = arith.constant 0 : i32
    %c0_i32_1 = arith.constant 0 : i32
    return %arg0, %c0_i32, %c0_i32_0 : i32, i32, i32
  }
  func.func @transform_1(%arg0: i32) -> (i32, i32, i32) {
    %c0_i32 = arith.constant 0 : i32
    %c0_i32_0 = arith.constant 0 : i32
    %c0_i32_1 = arith.constant 0 : i32
    return %arg0, %c0_i32, %c0_i32_0 : i32, i32, i32
  }
  func.func @transform_2(%arg0: i32) -> (i32, i32) {
    %c0_i32 = arith.constant 0 : i32
    %c0_i32_0 = arith.constant 0 : i32
    return %arg0, %c0_i32 : i32, i32
  }
  func.func @transform_3(%arg0: i32) -> (i32, i32) {
    %c0_i32 = arith.constant 0 : i32
    %c0_i32_0 = arith.constant 0 : i32
    %c0_i32_1 = arith.constant 0 : i32
    return %c0_i32, %c0_i32_0 : i32, i32
  }
  func.func @transform_4(%arg0: i32) -> (i32, i32) {
    %c0_i32 = arith.constant 0 : i32
    %c0_i32_0 = arith.constant 0 : i32
    %c0_i32_1 = arith.constant 0 : i32
    return %c0_i32, %c0_i32_0 : i32, i32
  }
  func.func @transform_5(%arg0: i32) -> (i32, i32) {
    %c0_i32 = arith.constant 0 : i32
    %c0_i32_0 = arith.constant 0 : i32
    %c0_i32_1 = arith.constant 0 : i32
    return %c0_i32, %c0_i32_0 : i32, i32
  }
  func.func @transform_6(%arg0: i32) -> i32 {
    %c0_i32 = arith.constant 0 : i32
    %c0_i32_0 = arith.constant 0 : i32
    return %c0_i32 : i32
  }
  func.func @transform_7(%arg0: i32) -> (i32, i32) {
    %c0_i32 = arith.constant 0 : i32
    %c0_i32_0 = arith.constant 0 : i32
    return %arg0, %c0_i32 : i32, i32
  }
}

</mosaic_0001>

<bundles_post_ra>
// kernel: tpu_custom_call.1
= control target key start
LH: loop header
LB: loop body
LE: loop exit
PB: predicated region body
PF: predicated region fallthrough
CT: control target
= control target key end

     0   :  { %vm41_vm0 = vcmask 261120   ;;  %s408_s0 = inlined_call_operand.vmem [shape: f32[2,8,32], index: 0, kind: input, shape index: {}]   ;;  %s409_s1 = inlined_call_operand.vmem [shape: f32[2,8,3], index: 1, kind: input, shape index: {}]   ;;  %s410_s2 = inlined_call_operand.vmem [shape: f32[2,8], index: 2, kind: input, shape index: {}]   ;;  %s411_s3 = inlined_call_operand.vmem [shape: f32[32,16], index: 3, kind: input, shape index: {}]   ;;  %s412_s4 = inlined_call_operand.vmem [shape: f32[1,16], index: 4, kind: input, shape index: {}]   ;;  %s413_s5 = inlined_call_operand.vmem [shape: f32[1,16], index: 5, kind: input, shape index: {}]   ;;  %s414_s6 = inlined_call_operand.<no memory space> [shape: f32[1], index: 6, kind: input, shape index: {}]   ;;  %s415_s7 = inlined_call_operand.hbm [shape: f32[2,3], index: 7, kind: output, shape index: {}]  }
   0x1   :  { %v30_v0 = vld [vmem:[%s411_s3] sm:$0xff]  ;;  %v31_v1 = vld [vmem:[%s411_s3 + $0x8] sm:$0xff]  ;;  %v32_v2 = vld [vmem:[%s411_s3 + $0x10] sm:$0xff] }
   0x2   :  { %v274_v3 = vpack.c.bf16 %v31_v1, %v30_v0  ;;  %v33_v4 = vld [vmem:[%s411_s3 + $0x18] sm:$0xff]  ;;  %v28_v5 = vld [vmem:[%s408_s0] sm:$0xff] }
   0x3   :  { %v278_v6 = vpack.c.bf16 %v33_v4, %v32_v2  ;;  %271 = vmatprep.mubr.msk.f32.mxu0 %vm41_vm0, %v28_v5 }
   0x4   :  { %13 = vsyncpa [#allocation4], 0  ;;  %275 = vmatprep.subr.bf16.mxu0 %v274_v3  ;;  %v29_v7 = vld [vmem:[%s408_s0 + $0x8] sm:$0xff]  ;;  %v183_v8 = vlaneseq  ;;  %v181_v10 = vld [vmem:[%s410_s2] sm:$0x3]  ;;  %vm170_vm5 = vcmask 130048   ;;  %v178_v58 = vstv %s414_s6 }
   0x5   :  { %277 = vmatpush3.bf16.msra.mxu0 %v274_v3  ;;  %v251_v15 = vld [vmem:[%s412_s4] ss:$0 sm:$0xff]  ;;  %v318_v57 = vmov 0   ;;  %vm215_vm6 = vcmask 23552   ;;  %s319_s6 = smov [#allocation3]   ;;  %vm232_vm7 = vcmask 1041409  }
   0x6   :  { %279 = vmatprep.subr.bf16.mxu0 %v278_v6  ;;  %v184_v9 = vshrl.u32 %v183_v8, 7  ;;  %v256_v50 = vld [vmem:[%s413_s5] ss:$0 sm:$0xff]  ;;  %284 = vset.pattern.permute.xlu0 %v318_v57  ;;  %s243_s20 = sshll.u32 %s319_s6, 4  ;;  %vm235_vm8 = vcmask 17408   ;;  %s244_s20 = int_to_ptr.vmem [resolvable:$true] %s243_s20 }
   0x7   :  { %285 = vset.pattern.permute.xlu1 %v318_v57  ;;  %v201_v3 = vld [vmem:[%s409_s1] sm:$0xff]  ;;  %p299_p1 = scmp.lt.s32.totalorder %s244_s20, %s244_s20 }
   0x8   :  { %v185_v11 = vsub.s32 0, %v184_v9  ;;  %v192_v12 = vsub.s32 1, %v184_v9 }
   0x9   :  { %281 = vmatpush3.bf16.msra.mxu0 %v278_v6  ;;  %v202_v6 = vld [vmem:[%s409_s1 + $0x8] sm:$0xff]  ;;  %s294_s1 = scalar_lea.vmem %s244_s20, 32 }
   0xa   :  { %v186_v13 = vrot.slane %v181_v10, %v185_v11  ;;  %v193_v14 = vrot.slane %v181_v10, %v192_v12  ;;  %p295_p0 = scmp.ne.s32.totalorder %s244_s20, %s294_s1  ;;  %p300_p2 = scmp.lt.s32.totalorder %s294_s1, %s294_s1 }
   0xc   :  { %272 = vmatmul.mubr.msk.f32.vlgmr.msra.gmra.mrb[0].mxu0 %vm41_vm0, %v29_v7  ;;  %188 = vbcast.lane.b32.xlu1 %v186_v13, 256  ;;  %p301_p3 = por %p300_p2, %p299_p1 }
   0xe   :  { %p302_p4 = pnand %p301_p3, %p295_p0 }
  0x10   :  { %195 = vbcast.lane.b32.xlu1 %v193_v14, 256 }
  0x7e   :  { %v189_v59 = vpop.permute.xlu1 %188 }
  0x82   :  { %v196_v0 = vpop.permute.xlu1 %195 }
  0xdf   :  { %v273_v16 = vpop.f32.mrb[0].mxu0 }
  0xe0   :  { %v120_v17 = vadd.f32 %v273_v16, %v251_v15  ;;  %v114_v18 = vpop.f32.mrb[1].mxu0 }
  0xe1   :  { %v115_v19 = vadd.f32 %v251_v15, %v114_v18 }
  0xe2   :  { %v130_v20 = vand.u32 2147483647, %v120_v17  ;;  %v124_v40 = vmax.f32 %v120_v17, 0.0  ;;  %vm126_vm3 = vcmp.ne.f32.partialorder %v120_v17, %v120_v17 }
  0xe3   :  { %v129_v21 = vand.u32 2147483647, %v115_v19  ;;  %v123_v43 = vmax.f32 %v115_v19, 0.0  ;;  %vm125_vm4 = vcmp.ne.f32.partialorder %v115_v19, %v115_v19 }
  0xe4   :  { %v132_v22 = vsub.f32 0.0, %v130_v20 }
  0xe5   :  { %v131_v23 = vsub.f32 0.0, %v129_v21 }
  0xe6   :  { %v135_v24 = vmul.f32 1.442695, %v132_v22 }
  0xe7   :  { %v133_v25 = vmul.f32 1.442695, %v131_v23 }
  0xe8   :  { %286 = vpow2.f32 %v135_v24 }
  0xe9   :  { %288 = vpow2.f32 %v133_v25 }
  0xf2   :  { %v287_v26 = vpop.eup %286 }
  0xf3   :  { %v289_v27 = vpop.eup %288  ;;  %v146_v28 = vadd.f32 1.0, %v287_v26  ;;  %v149_v30 = vmul.f32 -0.5, %v287_v26  ;;  %v152_v34 = vand.u32 2147483647, %v287_v26 }
  0xf4   :  { %v137_v29 = vadd.f32 1.0, %v289_v27  ;;  %v140_v31 = vmul.f32 -0.5, %v289_v27  ;;  %v143_v35 = vand.u32 2147483647, %v289_v27 }
  0xf5   :  { %290 = vlog2.f32 %v146_v28  ;;  %v150_v32 = vadd.f32 1.0, %v149_v30  ;;  %vm153_vm1 = vcmp.lt.f32.partialorder %v152_v34, 0.0004427343 }
  0xf6   :  { %292 = vlog2.f32 %v137_v29  ;;  %v141_v33 = vadd.f32 1.0, %v140_v31  ;;  %vm144_vm2 = vcmp.lt.f32.partialorder %v143_v35, 0.0004427343 }
  0xf7   :  { %v151_v39 = vmul.f32 %v287_v26, %v150_v32 }
  0xf8   :  { %v142_v42 = vmul.f32 %v289_v27, %v141_v33 }
  0xff   :  { %v291_v36 = vpop.eup %290 }
 0x100   :  { %v293_v37 = vpop.eup %292  ;;  %v148_v38 = vmul.f32 0.6931472, %v291_v36 }
 0x101   :  { %v139_v41 = vmul.f32 0.6931472, %v293_v37 }
 0x102   :  { %v154_v44 = vsel %vm153_vm1, %v151_v39, %v148_v38 }
 0x103   :  { %v145_v45 = vsel %vm144_vm2, %v142_v42, %v139_v41  ;;  %v156_v46 = vadd.f32 %v154_v44, %v124_v40 }
 0x104   :  { %v155_v47 = vadd.f32 %v145_v45, %v123_v43 }
 0x105   :  { %v158_v48 = vsel %vm126_vm3, %v120_v17, %v156_v46 }
 0x106   :  { %v157_v49 = vsel %vm125_vm4, %v115_v19, %v155_v47  ;;  %v255_v52 = vadd.f32 -0.6931472, %v158_v48 }
 0x107   :  { %v254_v51 = vadd.f32 -0.6931472, %v157_v49 }
 0x108   :  { %v169_v55 = vmul.f32 %v256_v50, %v255_v52 }
 0x109   :  { %v168_v53 = vmul.f32 %v256_v50, %v254_v51 }
 0x10a   :  { %v174_v56 = vsel %vm170_vm5, %v169_v55, 0.0 }
 0x10b   :  { %v171_v54 = vsel %vm170_vm5, %v168_v53, 0.0 }
 0x10c   :  { %172 = vadd.xlane.f32.xlu0 %v171_v54 }
 0x110   :  { %175 = vadd.xlane.f32.xlu0 %v174_v56 }
 0x199   :  { %v173_v60 = vpop.xlane.xlu0 %172 }
 0x19a   :  { %v179_v61 = vadd.f32 %v178_v58, %v173_v60 }
 0x19c   :  { %v199_v62 = vmul.f32 %v189_v59, %v179_v61 }
 0x19d   :  { %v176_v63 = vpop.xlane.xlu0 %175 }
 0x19e   :  { %v180_v1 = vadd.f32 %v178_v58, %v176_v63  ;;  %205 = vperm.xlu0 %284, %v199_v62  }
 0x1a0   :  { %v200_v2 = vmul.f32 %v196_v0, %v180_v1 }
 0x1a2   :  { %210 = vperm.xlu1 %285, %v200_v2  }
 0x21d   :  { %v206_v4 = vpop.permute.xlu0 %205 }
 0x21e   :  { %v213_v5 = vmul.f32 %v206_v4, %v201_v3 }
 0x220   :  { %v216_v7 = vsel %vm215_vm6, %v213_v5, 0.0 }
 0x221   :  { %v217_v8 = vrot.slane %v216_v7, 4  ;;  %v211_v9 = vpop.permute.xlu1 %210 }
 0x222   :  { %v214_v10 = vmul.f32 %v211_v9, %v202_v6 }
 0x223   :  { %v218_v11 = vadd.f32 %v217_v8, %v216_v7 }
 0x224   :  { %v223_v12 = vsel %vm215_vm6, %v214_v10, 0.0 }
 0x225   :  { %v219_v13 = vrot.slane %v218_v11, 2  ;;  %v224_v14 = vrot.slane %v223_v12, 4 }
 0x227   :  { %v220_v15 = vadd.f32 %v219_v13, %v218_v11  ;;  %v225_v16 = vadd.f32 %v224_v14, %v223_v12 }
 0x229   :  { %v226_v17 = vrot.slane %v225_v16, 2  ;;  %v221_v18 = vrot.slane %v220_v15, 1 }
 0x22b   :  { %v227_v19 = vadd.f32 %v226_v17, %v225_v16  ;;  %v222_v21 = vadd.f32 %v221_v18, %v220_v15 }
 0x22d   :  { %v228_v20 = vrot.slane %v227_v19, 1 }
 0x22f   :  { %v229_v22 = vadd.f32 %v228_v20, %v227_v19 }
 0x231   :  { %v233_v23 = vsel %vm232_vm7, %v229_v22, %v222_v21 }
 0x232   :  { %236 = vst.msk [vmem:[#allocation3] sm:$0x3] %vm235_vm8, %v233_v23 }
 0x233   :  { %305 = shalt.err (!%p302_p4)
}
 0x234   :  { %s306_s23 = scalar_lea.hbm %s415_s7, 32 }
 0x235   :  { %p307_p5 = scmp.ne.s32.totalorder %s415_s7, %s306_s23  ;;  %p310_p6 = scmp.lt.u32.totalorder %s306_s23, %s415_s7 }
 0x237   :  { %p312_p7 = pnand %p310_p6, %p307_p5 }
 0x239   :  { %315 = shalt.err (!%p312_p7)
}
 0x23a   :  { %246 = dma.vmem_to_hbm [thread:$0]  %s244_s20, 32, %s415_s7, [#allocation4]  }
 0x23b   :  { %316 = dma.done.wait [#allocation4], 32  }
 0x23c   :  { %317 = vsyncadd [#allocation4], 4294967264 }
 0x23d   :  { %250 = vsyncpa [#allocation4], 1 }

</bundles_post_ra>
